<compile_context>
chip_gen: v7x
topology: tpu7x:2x2x1
jax: 0.10.0
libtpu: 0.0.40
codegen_flags: <defaults>
</compile_context>

<pallas_src>
import jax
import jax.numpy as jnp
from jax.experimental import pallas as pl
from jax.experimental.pallas import tpu as pltpu  # noqa: F401  (TPU backend)


def _noop_kernel(x_hbm_ref, o_hbm_ref):
    # forward(x) = x.  The output buffer is aliased to the input buffer, so
    # there is nothing to compute and nothing to move.
    del x_hbm_ref, o_hbm_ref


@jax.jit
def identity(x):
    """Pallas implementation of Identity.forward (returns x unchanged)."""
    if x.size == 0:
        # Nothing to do for empty arrays.
        return x
    return pl.pallas_call(
        _noop_kernel,
        out_shape=jax.ShapeDtypeStruct(x.shape, x.dtype),
        # Raw HBM refs: no BlockSpec tiling, no automatic HBM<->VMEM DMA.
        in_specs=[pl.BlockSpec(memory_space=pl.ANY)],
        out_specs=pl.BlockSpec(memory_space=pl.ANY),
        # Output buffer == input buffer: no writeback, no in-kernel copy.
        # (Donate x at the caller to let XLA also elide its defensive copy.)
        input_output_aliases={0: 0},
        # Accurate (zero-cost) picture for XLA's scheduler.
        cost_estimate=pl.CostEstimate(
            flops=0, transcendentals=0, bytes_accessed=0
        ),
    )(x)


if __name__ == "__main__":
    key = jax.random.PRNGKey(0)

    # Primary test: shape implied by the module's usage (NCHW).
    x = jax.random.normal(key, (2, 4, 16, 16), dtype=jnp.float32)
    y = identity(x)
    jax.block_until_ready(y)
    assert y.shape == x.shape and y.dtype == x.dtype
    assert bool(jnp.all(y == x))

    # Ragged / odd-shaped input: handled with zero extra passes (no pad/slice).
    x2 = jax.random.normal(jax.random.PRNGKey(0), (3, 5, 7), dtype=jnp.bfloat16)
    y2 = identity(x2)
    jax.block_until_ready(y2)
    assert y2.shape == x2.shape and y2.dtype == x2.dtype
    assert bool(jnp.all(y2 == x2))

    print("KERNEL_OK")
</pallas_src>

<mosaic_0001>
module attributes {stable_mosaic.version = 11 : i64} {
  func.func @_noop_kernel(%arg0: memref<2x4x16x16xf32, #tpu.memory_space<any>>, %arg1: memref<2x4x16x16xf32, #tpu.memory_space<any>>) attributes {dimension_semantics = [], scalar_prefetch = 0 : i64, scratch_operands = 0 : i64, tpu.core_type = #tpu.core_type<tc>} {
    return
  }
}

</mosaic_0001>

<bundles_post_ra>
// kernel: identity.1
= control target key start
LH: loop header
LB: loop body
LE: loop exit
PB: predicated region body
PF: predicated region fallthrough
CT: control target
= control target key end

     0   :  { %s16_s0 = inlined_call_operand.hbm [shape: f32[2,4,16,16], index: 0, kind: input, shape index: {}, may-alias: {0,1}]   ;;  %s17_s1 = inlined_call_operand.hbm [shape: f32[2,4,16,16], index: 1, kind: output, shape index: {}, may-alias: {0,1}]  }

</bundles_post_ra>
